<compile_context>
chip_gen: v5e
topology: v5e:2x2
jax: 0.10.0
libtpu: 0.0.40
codegen_flags: <defaults>
</compile_context>

<pallas_src>
import jax
import jax.numpy as jnp
from jax.experimental import pallas as pl
from jax.experimental.pallas import tpu as pltpu

FC_DIM = 64
ALPHA = 0.001


def odefunc_kernel(x_ref, wt_ref, b_ref, o_ref):
    x = x_ref[...]                       # (TB, D_in)   batch tile
    wt = wt_ref[...]                     # (D_in, D_out) = W.T, transposed in wrapper
    b = b_ref[...]                       # (1, D_out)
    # Linear: z = x @ W^T + b   (MXU matmul, f32 accumulate)
    z = jnp.dot(x, wt, preferred_element_type=jnp.float32) + b
    # smooth_leaky_relu: alpha*z + (1-alpha)*softplus(z), stable softplus form.
    sp = jnp.maximum(z, 0.0) + jnp.log1p(jnp.exp(-jnp.abs(z)))
    out = ALPHA * z + (1.0 - ALPHA) * sp
    o_ref[...] = out.astype(o_ref.dtype)


def odefunc_mlp_relu_forward(t, x, weight, bias, *, block_rows=512):
    """t is ignored (ConcatFC-with-identity-t semantics of the reference code).

    x: (B, D) f32, weight: (D, D) PyTorch-Linear convention, bias: (D,).
    Batch dim is tiled in blocks of `block_rows` (clamped to B, aligned to 8).
    """
    del t
    B, D = x.shape
    assert weight.shape == (D, D)
    assert bias.shape == (D,)

    # Hoist the transpose out of the kernel (done once per call, outside the grid loop).
    wt = weight.T                        # (D_in, D_out)
    b2d = bias.reshape(1, D)

    # Pick a batch tile: whole B if small, otherwise an 8-aligned tile <= block_rows.
    TB = min(block_rows, B)
    if TB != B:
        TB = max(8, (TB // 8) * 8)
    B_pad = pl.cdiv(B, TB) * TB
    x_in = x if B_pad == B else jnp.pad(x, ((0, B_pad - B), (0, 0)))
    grid = (B_pad // TB,)

    cost = pl.CostEstimate(
        flops=2 * B_pad * D * D,
        transcendentals=2 * B_pad * D,                      # exp + log per element
        bytes_accessed=2 * 4 * B_pad * D + 4 * D * D + 4 * D,
    )

    out = pl.pallas_call(
        odefunc_kernel,
        out_shape=jax.ShapeDtypeStruct((B_pad, D), x.dtype),
        grid=grid,
        in_specs=[
            pl.BlockSpec((TB, D), lambda i: (i, 0)),        # x: tiled along batch
            pl.BlockSpec((D, D), lambda i: (0, 0)),         # W.T: resident across steps
            pl.BlockSpec((1, D), lambda i: (0, 0)),         # bias: resident across steps
        ],
        out_specs=pl.BlockSpec((TB, D), lambda i: (i, 0)),
        compiler_params=pltpu.CompilerParams(
            dimension_semantics=("parallel",)),             # batch tiles are independent
        cost_estimate=cost,
    )(x_in, wt, b2d)

    if B_pad != B:
        out = out[:B]
    return out


def _reference(x, weight, bias):
    z = x @ weight.T + bias
    sp = jnp.maximum(z, 0.0) + jnp.log1p(jnp.exp(-jnp.abs(z)))
    return ALPHA * z + (1.0 - ALPHA) * sp


if __name__ == "__main__":
    key = jax.random.PRNGKey(0)
    kx, kb, kx2 = jax.random.split(key, 3)

    # Deterministic parameter init (mirrors module __init__ with reg_flag=True):
    # weight <- -12 * I ; bias <- small deterministic values (Linear bias exists).
    weight = -12.0 * jnp.eye(FC_DIM, dtype=jnp.float32)
    bias = 0.01 * jax.random.normal(kb, (FC_DIM,), dtype=jnp.float32)
    t = jnp.float32(0.0)                  # unused, kept for API parity

    # Case 1: small batch, multiple grid steps (exercises the tiled/pipelined path).
    B = 32
    x = jax.random.normal(kx, (B, FC_DIM), dtype=jnp.float32)
    out = odefunc_mlp_relu_forward(t, x, weight, bias, block_rows=8)
    out = jax.block_until_ready(out)
    assert out.shape == (B, FC_DIM)
    assert jnp.allclose(out, _reference(x, weight, bias), atol=1e-5, rtol=1e-5)

    # Case 2: ragged batch (exercises the padding path).
    B2 = 12
    x2 = jax.random.normal(kx2, (B2, FC_DIM), dtype=jnp.float32)
    out2 = odefunc_mlp_relu_forward(t, x2, weight, bias, block_rows=8)
    out2 = jax.block_until_ready(out2)
    assert out2.shape == (B2, FC_DIM)
    assert jnp.allclose(out2, _reference(x2, weight, bias), atol=1e-5, rtol=1e-5)

    # TODO(synk): the module's `self.nfe` side-effect counter has no kernel equivalent.
    print("KERNEL_OK")
</pallas_src>

<mosaic_0001>
module attributes {stable_mosaic.version = 11 : i64} {
  func.func @odefunc_kernel(%arg0: i32, %arg1: memref<8x64xf32, #tpu.memory_space<vmem>>, %arg2: memref<64x64xf32, #tpu.memory_space<vmem>>, %arg3: memref<1x64xf32, #tpu.memory_space<vmem>>, %arg4: memref<8x64xf32, #tpu.memory_space<vmem>>) attributes {dimension_semantics = [#tpu.dimension_semantics<parallel>], iteration_bounds = array<i64: 4>, scalar_prefetch = 0 : i64, scratch_operands = 0 : i64, tpu.core_type = #tpu.core_type<tc>, window_params = [{transform_indices = @transform_0, window_bounds = array<i64: 8, 64>}, {pipeline_mode = #tpu.pipeline_mode<synchronous>, transform_indices = @transform_1, window_bounds = array<i64: 64, 64>}, {pipeline_mode = #tpu.pipeline_mode<synchronous>, transform_indices = @transform_2, window_bounds = array<i64: 1, 64>}, {transform_indices = @transform_3, window_bounds = array<i64: 8, 64>}]} {
    %c0 = arith.constant 0 : index
    %c0_0 = arith.constant 0 : index
    %0 = vector.load %arg1[%c0, %c0_0] : memref<8x64xf32, #tpu.memory_space<vmem>>, vector<8x64xf32>
    %c0_1 = arith.constant 0 : index
    %c0_2 = arith.constant 0 : index
    %1 = vector.load %arg2[%c0_1, %c0_2] : memref<64x64xf32, #tpu.memory_space<vmem>>, vector<64x64xf32>
    %c0_3 = arith.constant 0 : index
    %c0_4 = arith.constant 0 : index
    %2 = vector.load %arg3[%c0_3, %c0_4] : memref<1x64xf32, #tpu.memory_space<vmem>>, vector<1x64xf32>
    %cst = arith.constant dense<0.000000e+00> : vector<8x64xf32>
    %3 = tpu.matmul %0, %1, %cst {dimension_numbers = #tpu.dot_dimension_numbers<[1], [0], [0], [1], [0, 0, 1, 1], [], []>} : vector<8x64xf32>, vector<64x64xf32>, vector<8x64xf32> -> vector<8x64xf32>
    %4 = vector.broadcast %2 : vector<1x64xf32> to vector<8x64xf32>
    %5 = arith.addf %3, %4 : vector<8x64xf32>
    %cst_5 = arith.constant 0.000000e+00 : f32
    %6 = vector.broadcast %cst_5 : f32 to vector<8x64xf32>
    %7 = arith.maximumf %5, %6 : vector<8x64xf32>
    %8 = math.absf %5 : vector<8x64xf32>
    %cst_6 = arith.constant 0.000000e+00 : f32
    %9 = vector.broadcast %cst_6 : f32 to vector<8x64xf32>
    %10 = arith.subf %9, %8 : vector<8x64xf32>
    %11 = math.exp %10 : vector<8x64xf32>
    %12 = math.log1p %11 : vector<8x64xf32>
    %13 = arith.addf %7, %12 : vector<8x64xf32>
    %cst_7 = arith.constant 1.000000e-03 : f32
    %14 = vector.broadcast %cst_7 : f32 to vector<8x64xf32>
    %15 = arith.mulf %14, %5 : vector<8x64xf32>
    %cst_8 = arith.constant 9.990000e-01 : f32
    %16 = vector.broadcast %cst_8 : f32 to vector<8x64xf32>
    %17 = arith.mulf %16, %13 : vector<8x64xf32>
    %18 = arith.addf %15, %17 : vector<8x64xf32>
    %c0_9 = arith.constant 0 : index
    %c0_10 = arith.constant 0 : index
    %19 = vector.load %arg4[%c0_9, %c0_10] : memref<8x64xf32, #tpu.memory_space<vmem>>, vector<8x64xf32>
    tpu.vector_store %arg4[%c0_9, %c0_10], %18 {strides = array<i32>} : memref<8x64xf32, #tpu.memory_space<vmem>>, vector<8x64xf32>,
    return
  }
  func.func @transform_0(%arg0: i32) -> (i32, i32) {
    %c0_i32 = arith.constant 0 : i32
    %c0_i32_0 = arith.constant 0 : i32
    return %arg0, %c0_i32 : i32, i32
  }
  func.func @transform_1(%arg0: i32) -> (i32, i32) {
    %c0_i32 = arith.constant 0 : i32
    %c0_i32_0 = arith.constant 0 : i32
    %c0_i32_1 = arith.constant 0 : i32
    return %c0_i32, %c0_i32_0 : i32, i32
  }
  func.func @transform_2(%arg0: i32) -> (i32, i32) {
    %c0_i32 = arith.constant 0 : i32
    %c0_i32_0 = arith.constant 0 : i32
    %c0_i32_1 = arith.constant 0 : i32
    return %c0_i32, %c0_i32_0 : i32, i32
  }
  func.func @transform_3(%arg0: i32) -> (i32, i32) {
    %c0_i32 = arith.constant 0 : i32
    %c0_i32_0 = arith.constant 0 : i32
    return %arg0, %c0_i32 : i32, i32
  }
}

</mosaic_0001>

<bundles_post_ra>
// kernel: tpu_custom_call.1
= control target key start
LH: loop header
LB: loop body
LE: loop exit
PB: predicated region body
PF: predicated region fallthrough
CT: control target
= control target key end

     0   :  { %8 = vsyncpa [#allocation3], 0  ;;  %s734_s0 = inlined_call_operand.hbm [shape: f32[32,64], index: 0, kind: input, shape index: {}]   ;;  %s735_s1 = inlined_call_operand.hbm [shape: f32[64,64], index: 1, kind: input, shape index: {}]   ;;  %s736_s2 = inlined_call_operand.vmem [shape: f32[1,64], index: 2, kind: input, shape index: {}]   ;;  %s737_s3 = inlined_call_operand.hbm [shape: f32[32,64], index: 3, kind: output, shape index: {}]  }
   0x1   :  { %10 = vsyncpa [#allocation3 + $0x1], 0 }
   0x2   :  { %11 = vsyncpa [#allocation6], 0 }
   0x3   :  { %12 = vsyncpa [#allocation4], 0 }
   0x4   :  { %14 = vsyncpa [#allocation4 + $0x1], 0  ;;  %s591_s12 = smov 0   ;;  %s593_s13 = smov 0  }
   0x5   :  { %s595_s14 = smov 0   ;;  %s597_s15 = smov 0  }
   0x6 LB: > { %s130_s18 = sshll.u32 %s735_s1, 4  ;;  %s615_s19 = sadd.s32 4294967295, %s566_s15   ;;  %s566_s15 = sphi %s597_s15, %s746_s15   ;;  %s562_s14 = sphi %s595_s14, %s745_s14   ;;  %s558_s13 = sphi %s593_s13, %s744_s13   ;;  %s554_s12 = sphi %s591_s12, %s743_s12   ;;  %s131_s18 = int_to_ptr.hbm [resolvable:$true] %s130_s18 }
   0x7   : > { %p358_p0 = scmp.ge.s32.totalorder %s566_s15, 1  ;;  %p41_p1 = scmp.eq.s32.totalorder %s615_s19, 0 }
   0x8   : > { %p119_p2 = scmp.lt.s32.totalorder %s566_s15, 5  ;;  %s568_s21 = smov [#allocation5]  }
   0x9   : > { %s132_s22 = sshll.u32 %s568_s21, 4  ;;  %s569_s23 = smov 128   ;;  %s133_s22 = int_to_ptr.vmem [resolvable:$true] %s132_s22 }
   0xa   : > { %p620_p3 = pnand %p358_p0, %p119_p2  ;;  %s570_s24 = smov 8  }
   0xb   : > { %s357_s25 = sadd.s32 4294967294, %s566_s15   ;;  %s630_s26 = sadd.s32 1, %s566_s15  }
   0xc   : > { %p380_p4 = pneg %p620_p3  ;;  %s27_s27 = sadd.s32 1, %s562_s14 }
   0xd   : > { %s24_s28 = ssub.s32 %s566_s15, %s630_s26  ;;  %p34_p6 = scmp.ne.s32.totalorder %s562_s14, %s558_s13 }
   0xe   : > { %p381_p5 = pnand %p380_p4, %p41_p1  ;;  %p25_p7 = scmp.eq.s32.totalorder %s24_s28, 0 }
   0xf   : > { %p35_p8 = scmp.eq.s32.totalorder %s566_s15, 0  ;;  %p40_p9 = scmp.ne.s32.totalorder %s558_s13, %s554_s12 }
  0x10   : > { %383 = dma.hbm_to_vmem [thread:$0]  (!%p381_p5), %s131_s18, 1024, %s133_s22, [#allocation6], %s569_s23, %s569_s23, %s570_s24  }
  0x11   : > { %p106_p10 = scmp.eq.s32.totalorder %s615_s19, 3  ;;  %p646_p11 = por %p41_p1, %p40_p9 }
  0x12   : > { %s642_s29 = scalar_select %p25_p7, %s562_s14, %s27_s27  }
  0x13   : > { %p650_p12 = por %p106_p10, %p34_p6  ;;  %p112_p13 = scmp.eq.s32.totalorder %s357_s25, 3 }
  0x14   : > { %p36_p0 = por %p35_p8, %p34_p6  ;;  %s149_s5 = sand.u32 1, %s562_s14  }
  0x15   : > { %p655_p2 = por %p112_p13, %p40_p9  ;;  %p393_p4 = scmp.lt.s32.totalorder %s566_s15, 4 }
  0x16   : > { %s361_s7 = sshll.u32 %s149_s5, 3  ;;  %s362_s8 = sshll.u32 %s566_s15, 3 }
  0x17   : > { %s157_s11 = scalar_lea.hbm %s734_s0, %s362_s8  ;;  %s153_s17 = scalar_lea.vmem [#allocation2], %s361_s7 }
  0x18   : > { %s159_s16 = sshll.u32 %s157_s11, 4  ;;  %s161_s18 = sshll.u32 %s153_s17, 4  ;;  %s160_s16 = int_to_ptr.hbm [resolvable:$true] %s159_s16  ;;  %s162_s18 = int_to_ptr.vmem [resolvable:$true] %s161_s18 }
  0x19   : > { %p664_p5 = pnand %p393_p4, %p36_p0  ;;  %s150_s22 = scalar_lea.sflag [#allocation3], %s149_s5 }
  0x1a   : > { %s466_s23 = sshra.s32 %s160_s16, 4  ;;  %s473_s28 = scalar_lea.hbm %s734_s0, 32  ;;  %s467_s23 = int_to_ptr.hbm [resolvable:$true] %s466_s23 }
  0x1b   : > { %s468_s24 = scalar_lea.hbm %s467_s23, 8  ;;  %p470_p7 = pneg %p664_p5 }
  0x1c   : > { %p469_p6 = scmp.ne.s32.totalorder %s467_s23, %s468_s24  ;;  %p474_p10 = scmp.lt.s32.totalorder %s467_s23, %s734_s0 }
  0x1d   : > { %p475_p13 = scmp.lt.s32.totalorder %s473_s28, %s468_s24 }
  0x1e   : > { %p471_p8 = pnand %p470_p7, %p469_p6 }
  0x1f   : > { %p476_p0 = por %p475_p13, %p474_p10 }
  0x20   : > { %p472_p9 = pneg %p471_p8 }
  0x22   : > { %p477_p4 = pnand %p476_p0, %p472_p9 }
  0x24   : > { %480 = shalt.err (!%p477_p4)
}
  0x25   : > { %387 = dma.hbm_to_vmem [thread:$0]  (!%p664_p5), %s160_s16, 128, %s162_s18, %s150_s22  }
  0x26   : > { %170 = sbr.rel (%p620_p3) target bundleno = 224 (0xe0), region = 32  ;;  %s681_s5 = sand.u32 (!%p620_p3), 1, %s558_s13  }
  0x27   : > { %s364_s9 = sshll.u32 (!%p620_p3), %s681_s5, 3  ;;  %s173_s10 = scalar_lea.sflag (!%p620_p3), [#allocation3], %s681_s5 }
  0x28   : > { %s176_s11 = scalar_lea.vmem (!%p620_p3), [#allocation2], %s364_s9 }
  0x2b   : > { %541 = dma.done.wait (%p646_p11), %s173_s10, 128  }
  0x2c   : > { %543 = vsyncadd (%p646_p11), %s173_s10, 4294967168 }
  0x2d   : > { %545 = dma.done.wait (%p41_p1), [#allocation6], 1024  }
  0x2e   : > { %547 = vsyncadd (%p41_p1), [#allocation6], 4294966272  ;;  %v213_v0 = vld [vmem:[#allocation5 + $0x38] sm:$0xff]  ;;  %v212_v1 = vld [vmem:[#allocation5 + $0x30] sm:$0xff]  ;;  %vm218_vm0 = vcmask 523264   ;;  %s369_s16 = sshll.u32 %s615_s19, 3 }
  0x2f   : > { %230 = vmatpush.msra.mxu0 %v213_v0  ;;  %v211_v2 = vld [vmem:[#allocation5 + $0x28] sm:$0xff]  ;;  %v210_v3 = vld [vmem:[#allocation5 + $0x20] sm:$0xff]  ;;  %v209_v4 = vld [vmem:[#allocation5 + $0x18] sm:$0xff]  ;;  %s272_s21 = scalar_lea.hbm %s737_s3, %s369_s16  ;;  %s204_s22 = scalar_lea.vmem [#allocation7], %s364_s9 }
  0x30   : > { %v208_v5 = vld [vmem:[#allocation5 + $0x10] sm:$0xff]  ;;  %v207_v6 = vld [vmem:[#allocation5 + $0x8] sm:$0xff]  ;;  %v206_v7 = vld [vmem:[#allocation5] sm:$0xff]  ;;  %s274_s23 = sshll.u32 %s204_s22, 4  ;;  %s276_s24 = sshll.u32 %s272_s21, 4  ;;  %s275_s23 = int_to_ptr.vmem [resolvable:$true] %s274_s23  ;;  %s277_s24 = int_to_ptr.hbm [resolvable:$true] %s276_s24 }
  0x31   : > { %231 = vmatpush.msra.mxu0 %v212_v1  ;;  %v205_v8 = vld [vmem:[%s176_s11] sm:$0xff]  ;;  %s262_s19 = scalar_lea.sflag [#allocation4], %s681_s5  ;;  %s510_s25 = sshra.s32 %s277_s24, 4  ;;  %s511_s25 = int_to_ptr.hbm [resolvable:$true] %s510_s25 }
  0x32   : > { %v431_v9 = vld [vmem:[%s736_s2] ss:$0 sm:$0xff]  ;;  %s512_s27 = scalar_lea.hbm %s511_s25, 8  ;;  %s516_s8 = scalar_lea.hbm %s737_s3, 32 }
  0x33   : > { %232 = vmatpush.msra.mxu0 %v211_v2  ;;  %p513_p1 = scmp.ne.s32.totalorder %s511_s25, %s512_s27  ;;  %p517_p5 = scmp.lt.s32.totalorder %s511_s25, %s737_s3 }
  0x34   : > { %p518_p6 = scmp.lt.s32.totalorder %s516_s8, %s512_s27 }
  0x35   : > { %233 = vmatpush.msra.mxu0 %v210_v3  ;;  %p514_p3 = pnand %p513_p1, %p650_p12 }
  0x36   : > { %p519_p7 = por %p518_p6, %p517_p5 }
  0x37   : > { %234 = vmatpush.msra.mxu0 %v209_v4  ;;  %p515_p11 = pneg %p514_p3 }
  0x39   : > { %235 = vmatpush.msra.mxu0 %v208_v5  ;;  %p520_p8 = pnand %p519_p7, %p515_p11 }
  0x3b   : > { %236 = vmatpush.msra.mxu0 %v207_v6 }
  0x3d   : > { %237 = vmatpush.msra.mxu0 %v206_v7 }
  0x3e   : > { %367 = vmatmul.msk.f32.vlgmr.msra.gmra.mxu0 %vm218_vm0, %v205_v8 }
  0xbb   : > { %v239_v10 = vpop.f32.mrf.mxu0 }
  0xbc   : > { %v240_v11 = vadd.f32 %v431_v9, %v239_v10 }
  0xbe   : > { %v243_v12 = vand.u32 2147483647, %v240_v11  ;;  %v242_v23 = vmax.f32 %v240_v11, 0.0  ;;  %v257_v26 = vmul.f32 0.001, %v240_v11 }
  0xc0   : > { %v244_v13 = vsub.f32 0.0, %v243_v12 }
  0xc2   : > { %v245_v14 = vmul.f32 1.442695, %v244_v13 }
  0xc4   : > { %432 = vpow2.f32 %v245_v14 }
  0xca   : > { %v433_v15 = vpop.eup %432 }
  0xcb   : > { %v247_v16 = vadd.f32 1.0, %v433_v15  ;;  %v250_v17 = vmul.f32 -0.5, %v433_v15  ;;  %v253_v19 = vand.u32 2147483647, %v433_v15 }
  0xcd   : > { %434 = vlog2.f32 %v247_v16  ;;  %v251_v18 = vadd.f32 1.0, %v250_v17  ;;  %vm254_vm1 = vcmp.lt.f32.partialorder %v253_v19, 0.0004427343 }
  0xcf   : > { %v252_v22 = vmul.f32 %v433_v15, %v251_v18 }
  0xd3   : > { %v435_v20 = vpop.eup %434 }
  0xd4   : > { %v249_v21 = vmul.f32 0.6931472, %v435_v20 }
  0xd6   : > { %v255_v24 = vsel %vm254_vm1, %v252_v22, %v249_v21 }
  0xd7   : > { %v256_v25 = vadd.f32 %v255_v24, %v242_v23 }
  0xd9   : > { %v258_v27 = vmul.f32 0.999, %v256_v25 }
  0xdb   : > { %v259_v28 = vadd.f32 %v258_v27, %v257_v26 }
  0xdd   : > { %260 = vst.msk [vmem:[%s204_s22] sm:$0xff] %vm218_vm0, %v259_v28 }
  0xde   : > { %523 = shalt.err (!%p520_p8)
}
  0xdf   : > { %378 = dma.vmem_to_hbm [thread:$0]  (%p650_p12), %s275_s23, 128, %s277_s24, %s262_s19  }
  0xe0 PF: > { %p395_p9 = scmp.ge.s32.totalorder %s566_s15, 2  ;;  %s288_s5 = sand.u32 1, %s554_s12  }
  0xe1   : > { %s289_s11 = scalar_lea.sflag [#allocation4], %s288_s5 }
  0xe2   : > { %p389_p10 = pnand %p395_p9, %p655_p2 }
  0xe4   : > { %p390_p13 = pneg %p389_p10 }
  0xe6   : > { %549 = dma.done.wait (%p390_p13), %s289_s11, 128  }
  0xe7   : > { %551 = vsyncadd (%p390_p13), %s289_s11, 4294967168  ;;  %p17_p0 = scmp.ge.s32.totalorder %s630_s26, 6   ;;  %s743_s12 = smov %s558_s13 }
  0xe8   : > { %s744_s13 = smov %s562_s14  ;;  %s745_s14 = smov %s642_s29 }
  0xe9   : > { %s746_s15 = smov %s630_s26  ;;  %19 = sbr.rel (!%p17_p0) target bundleno = 6 (0x6), region = 81 }
  0xee   :  { %295 = vsyncpa [#allocation3], 1 }
  0xef   :  { %297 = vsyncpa [#allocation3 + $0x1], 1 }
  0xf0   :  { %298 = vsyncpa [#allocation6], 1 }
  0xf1   :  { %299 = vsyncpa [#allocation4], 1 }
  0xf2   :  { %301 = vsyncpa [#allocation4 + $0x1], 1 }

</bundles_post_ra>
